<compile_context>
chip_gen: v7x
topology: tpu7x:2x2x1
jax: 0.10.0
libtpu: 0.0.40
codegen_flags: <defaults>
</compile_context>

<pallas_src>
import jax
import jax.numpy as jnp
from jax.experimental import pallas as pl
from jax.experimental.pallas import tpu as pltpu


def outconv_kernel(w_ref, b_ref, x_ref, o_ref):
    """One grid step of the 1x1 conv.

    w_ref: (Cout, Cin)          f32 in SMEM (resident; scalar reads).
    b_ref: (Cout,)              f32 in SMEM.
    x_ref: (NB, Cin, TR, 128)   input tile in VMEM (spatial sublane+lane dense).
    o_ref: (NB, Cout, TR, 128)  output tile in VMEM (dense (8,128) stores).
    """
    cout, cin = w_ref.shape
    x = x_ref[...].astype(jnp.float32)  # dense load of the tile
    # TODO(synk): if Cin/Cout ever grow to >=128, switch to an MXU matmul with
    # Cout on lanes, a K(Cin) grid axis marked "arbitrary", and a pl.when-
    # initialized f32 VMEM accumulator instead of unrolled VPU FMAs.
    for co in range(cout):
        acc = x[:, 0:1, :, :] * w_ref[co, 0] + b_ref[co]  # bias folded into init
        for ci in range(1, cin):
            acc = acc + x[:, ci:ci + 1, :, :] * w_ref[co, ci]
        o_ref[:, co:co + 1, :, :] = acc.astype(o_ref.dtype)


def out_conv(x_nchw, weight, bias, *,
             vmem_budget_bytes=12 * 1024 * 1024,   # double-buffered in+out budget
             tiny_bytes=1 * 1024 * 1024):          # below this: one grid step
    """1x1 Conv2d forward (OutConv).

    Args:
      x_nchw: [B, Cin, H, W] input (PyTorch NCHW convention).
      weight: [Cout, Cin, 1, 1] conv weight.
      bias:   [Cout] conv bias.
    Returns:
      [B, Cout, H, W] output, same dtype as x.
    """
    B, Cin, H, W = x_nchw.shape
    Cout = weight.shape[0]
    S = H * W
    itemsize = jnp.dtype(x_nchw.dtype).itemsize
    sub_mult = max(1, 32 // itemsize)  # sublane multiple: 8 f32, 16 bf16, 32 int8

    # --- layout: (B, Cin, rows, 128) -- spatial folded onto sublanes+lanes. ---
    x3 = x_nchw.reshape(B, Cin, S)            # free, contiguous reshape
    pad = (-S) % 128
    if pad:
        # TODO(synk): non-multiple-of-128 spatial costs one extra pad pass.
        x3 = jnp.pad(x3, ((0, 0), (0, 0), (0, pad)))
    S_pad = S + pad
    rows = S_pad // 128
    x4 = x3.reshape(B, Cin, rows, 128)

    w2 = weight.reshape(Cout, Cin).astype(jnp.float32)
    b1 = bias.reshape(Cout).astype(jnp.float32)

    # --- tile selection (generation-safe VMEM budget, large HBM steps) ---
    bytes_per_row = (Cin + Cout) * 128 * itemsize
    total_bytes = B * rows * bytes_per_row
    max_rows = vmem_budget_bytes // (2 * bytes_per_row)
    max_rows = max(sub_mult, (max_rows // sub_mult) * sub_mult)

    if total_bytes <= tiny_bytes and rows <= max_rows:
        # Tiny head: a single grid step over the whole array.
        nb_block, tr = B, rows
    else:
        nb_block = 1
        if rows <= max_rows:
            if B == 1 and rows >= 2 * sub_mult:
                # Guarantee >= 2 parallel steps so both v7x TensorCores get work.
                tr = (((rows + 1) // 2) + sub_mult - 1) // sub_mult * sub_mult
            else:
                tr = rows
        else:
            tr = max_rows
    n_b = B // nb_block
    n_s = pl.cdiv(rows, tr)

    cost = pl.CostEstimate(
        flops=2 * B * Cout * Cin * S_pad,
        transcendentals=0,
        bytes_accessed=B * (Cin + Cout) * S_pad * itemsize + (w2.size + b1.size) * 4,
    )

    out4 = pl.pallas_call(
        outconv_kernel,
        out_shape=jax.ShapeDtypeStruct((B, Cout, rows, 128), x_nchw.dtype),
        grid_spec=pltpu.PrefetchScalarGridSpec(
            num_scalar_prefetch=0,
            grid=(n_b, n_s),
            in_specs=[
                # Tiny weight/bias live in SMEM, loaded once for the whole grid.
                pl.BlockSpec(memory_space=pltpu.MemorySpace.SMEM),
                pl.BlockSpec(memory_space=pltpu.MemorySpace.SMEM),
                # Input: channels small leading dim, spatial dense on (TR, 128).
                pl.BlockSpec((nb_block, Cin, tr, 128), lambda b, s: (b, 0, s, 0)),
            ],
            out_specs=pl.BlockSpec((nb_block, Cout, tr, 128),
                                   lambda b, s: (b, 0, s, 0)),
        ),
        compiler_params=pltpu.CompilerParams(
            dimension_semantics=("parallel", "parallel"),
        ),
        cost_estimate=cost,
    )(w2, b1, x4)

    out3 = out4.reshape(B, Cout, S_pad)[..., :S]
    return out3.reshape(B, Cout, H, W)


if __name__ == "__main__":
    # Small shapes consistent with OutConv: batch=2, in_channels=4,
    # out_channels=1 (binary classification head), spatial=16x16.
    B, Cin, Cout, H, W = 2, 4, 1, 16, 16

    key = jax.random.PRNGKey(0)
    kx, kw, kb = jax.random.split(key, 3)

    x = jax.random.normal(kx, (B, Cin, H, W), dtype=jnp.float32)

    # Deterministic parameter init (mimics PyTorch Conv2d default uniform bound).
    fan_in = Cin * 1 * 1
    bound = 1.0 / (fan_in ** 0.5)
    weight = jax.random.uniform(kw, (Cout, Cin, 1, 1), jnp.float32, -bound, bound)
    bias = jax.random.uniform(kb, (Cout,), jnp.float32, -bound, bound)

    out = out_conv(x, weight, bias)
    out = jax.block_until_ready(out)

    # Reference check with plain JAX (1x1 conv == channel einsum).
    ref = jnp.einsum("bchw,oc->bohw", x, weight.reshape(Cout, Cin)) + bias.reshape(
        1, Cout, 1, 1
    )
    assert out.shape == (B, Cout, H, W)
    assert jnp.allclose(out, ref, atol=1e-5, rtol=1e-5)

    print("KERNEL_OK")
</pallas_src>

<mosaic_0001>
module attributes {stable_mosaic.version = 11 : i64} {
  func.func @outconv_kernel(%arg0: i32, %arg1: i32, %arg2: memref<1x4xf32, #tpu.memory_space<smem>>, %arg3: memref<1xf32, #tpu.memory_space<smem>>, %arg4: memref<2x4x2x128xf32, #tpu.memory_space<vmem>>, %arg5: memref<2x1x2x128xf32, #tpu.memory_space<vmem>>) attributes {dimension_semantics = [#tpu.dimension_semantics<parallel>, #tpu.dimension_semantics<parallel>], iteration_bounds = array<i64: 1, 1>, scalar_prefetch = 0 : i64, scratch_operands = 0 : i64, tpu.core_type = #tpu.core_type<tc>, window_params = [{transform_indices = @transform_0, window_bounds = array<i64: 1, 4>}, {transform_indices = @transform_1, window_bounds = array<i64: 1>}, {transform_indices = @transform_2, window_bounds = array<i64: 2, 4, 2, 128>}, {transform_indices = @transform_3, window_bounds = array<i64: 2, 1, 2, 128>}]} {
    %c0 = arith.constant 0 : index
    %c0_0 = arith.constant 0 : index
    %c0_1 = arith.constant 0 : index
    %c0_2 = arith.constant 0 : index
    %0 = vector.load %arg4[%c0, %c0_0, %c0_1, %c0_2] : memref<2x4x2x128xf32, #tpu.memory_space<vmem>>, vector<2x4x2x128xf32>
    %1 = vector.extract_strided_slice %0 {offsets = [0, 0, 0, 0], sizes = [2, 1, 2, 128], strides = [1, 1, 1, 1]} : vector<2x4x2x128xf32> to vector<2x1x2x128xf32>
    %c0_3 = arith.constant 0 : index
    %c0_4 = arith.constant 0 : index
    %2 = memref.load %arg2[%c0_3, %c0_4] : memref<1x4xf32, #tpu.memory_space<smem>>
    %3 = vector.broadcast %2 : f32 to vector<2x1x2x128xf32>
    %4 = arith.mulf %1, %3 : vector<2x1x2x128xf32>
    %c0_5 = arith.constant 0 : index
    %5 = memref.load %arg3[%c0_5] : memref<1xf32, #tpu.memory_space<smem>>
    %6 = vector.broadcast %5 : f32 to vector<2x1x2x128xf32>
    %7 = arith.addf %4, %6 : vector<2x1x2x128xf32>
    %8 = vector.extract_strided_slice %0 {offsets = [0, 1, 0, 0], sizes = [2, 1, 2, 128], strides = [1, 1, 1, 1]} : vector<2x4x2x128xf32> to vector<2x1x2x128xf32>
    %c0_6 = arith.constant 0 : index
    %c1 = arith.constant 1 : index
    %9 = memref.load %arg2[%c0_6, %c1] : memref<1x4xf32, #tpu.memory_space<smem>>
    %10 = vector.broadcast %9 : f32 to vector<2x1x2x128xf32>
    %11 = arith.mulf %8, %10 : vector<2x1x2x128xf32>
    %12 = arith.addf %7, %11 : vector<2x1x2x128xf32>
    %13 = vector.extract_strided_slice %0 {offsets = [0, 2, 0, 0], sizes = [2, 1, 2, 128], strides = [1, 1, 1, 1]} : vector<2x4x2x128xf32> to vector<2x1x2x128xf32>
    %c0_7 = arith.constant 0 : index
    %c2 = arith.constant 2 : index
    %14 = memref.load %arg2[%c0_7, %c2] : memref<1x4xf32, #tpu.memory_space<smem>>
    %15 = vector.broadcast %14 : f32 to vector<2x1x2x128xf32>
    %16 = arith.mulf %13, %15 : vector<2x1x2x128xf32>
    %17 = arith.addf %12, %16 : vector<2x1x2x128xf32>
    %18 = vector.extract_strided_slice %0 {offsets = [0, 3, 0, 0], sizes = [2, 1, 2, 128], strides = [1, 1, 1, 1]} : vector<2x4x2x128xf32> to vector<2x1x2x128xf32>
    %c0_8 = arith.constant 0 : index
    %c3 = arith.constant 3 : index
    %19 = memref.load %arg2[%c0_8, %c3] : memref<1x4xf32, #tpu.memory_space<smem>>
    %20 = vector.broadcast %19 : f32 to vector<2x1x2x128xf32>
    %21 = arith.mulf %18, %20 : vector<2x1x2x128xf32>
    %22 = arith.addf %17, %21 : vector<2x1x2x128xf32>
    %c0_9 = arith.constant 0 : index
    %c0_10 = arith.constant 0 : index
    %c0_11 = arith.constant 0 : index
    %c0_12 = arith.constant 0 : index
    %23 = vector.load %arg5[%c0_9, %c0_10, %c0_11, %c0_12] : memref<2x1x2x128xf32, #tpu.memory_space<vmem>>, vector<2x1x2x128xf32>
    tpu.vector_store %arg5[%c0_9, %c0_10, %c0_11, %c0_12], %22 {strides = array<i32>} : memref<2x1x2x128xf32, #tpu.memory_space<vmem>>, vector<2x1x2x128xf32>,
    return
  }
  func.func @transform_0(%arg0: i32, %arg1: i32) -> (i32, i32) {
    %c0_i32 = arith.constant 0 : i32
    %c0_i32_0 = arith.constant 0 : i32
    %c0_i32_1 = arith.constant 0 : i32
    return %c0_i32, %c0_i32_0 : i32, i32
  }
  func.func @transform_1(%arg0: i32, %arg1: i32) -> i32 {
    %c0_i32 = arith.constant 0 : i32
    %c0_i32_0 = arith.constant 0 : i32
    return %c0_i32 : i32
  }
  func.func @transform_2(%arg0: i32, %arg1: i32) -> (i32, i32, i32, i32) {
    %c0_i32 = arith.constant 0 : i32
    %c0_i32_0 = arith.constant 0 : i32
    %c0_i32_1 = arith.constant 0 : i32
    return %arg0, %c0_i32, %arg1, %c0_i32_0 : i32, i32, i32, i32
  }
  func.func @transform_3(%arg0: i32, %arg1: i32) -> (i32, i32, i32, i32) {
    %c0_i32 = arith.constant 0 : i32
    %c0_i32_0 = arith.constant 0 : i32
    %c0_i32_1 = arith.constant 0 : i32
    return %arg0, %c0_i32, %arg1, %c0_i32_0 : i32, i32, i32, i32
  }
}

</mosaic_0001>

<bundles_post_ra>
// kernel: tpu_custom_call.1
= control target key start
LH: loop header
LB: loop body
LE: loop exit
PB: predicated region body
PF: predicated region fallthrough
CT: control target
= control target key end

     0   :  { %9 = vsyncpa [#allocation6], 0  ;;  %s228_s0 = inlined_call_operand.vmem [shape: f32[1,4], index: 0, kind: input, shape index: {}]   ;;  %s229_s1 = inlined_call_operand.<no memory space> [shape: f32[1], index: 1, kind: input, shape index: {}]   ;;  %s230_s2 = inlined_call_operand.hbm [shape: f32[2,4,2,128], index: 2, kind: input, shape index: {}]   ;;  %s231_s3 = inlined_call_operand.hbm [shape: f32[2,1,2,128], index: 3, kind: output, shape index: {}]  }
   0x1   :  { %10 = vsyncpa [#allocation4], 0 }
   0x2   :  { %11 = vsyncpa [#allocation5], 0  ;;  %s18_s14 = sshll.u32 %s228_s0, 4  ;;  %s19_s14 = int_to_ptr.vmem [resolvable:$true] %s18_s14 }
   0x3   :  { %s105_s15 = scalar_lea.vmem %s19_s14, 16  ;;  %p110_p1 = scmp.lt.s32.totalorder %s19_s14, %s19_s14 }
   0x4   :  { %p106_p0 = scmp.ne.s32.totalorder %s19_s14, %s105_s15  ;;  %p111_p2 = scmp.lt.s32.totalorder %s105_s15, %s105_s15 }
   0x6   :  { %p112_p3 = por %p111_p2, %p110_p1 }
   0x8   :  { %p113_p4 = pnand %p112_p3, %p106_p0 }
   0xa   :  { %116 = shalt.err (!%p113_p4)
}
   0xb   :  { %s167_s16 = smov [#allocation3]   ;;  %s168_s17 = smov [#allocation7]  }
   0xc   :  { %21 = dma.vmem_to_smem %s19_s14, 16, %s167_s16, [#allocation6]  }
   0xd   :  { %s29_s18 = sshll.u32 %s168_s17, 4  ;;  %s117_s21 = scalar_lea.hbm %s230_s2, 256  ;;  %s30_s18 = int_to_ptr.vmem [resolvable:$true] %s29_s18 }
   0xe   :  { %p118_p5 = scmp.ne.s32.totalorder %s230_s2, %s117_s21  ;;  %p121_p6 = scmp.lt.u32.totalorder %s117_s21, %s230_s2 }
  0x10   :  { %p123_p7 = pnand %p121_p6, %p118_p5 }
  0x12   :  { %126 = shalt.err (!%p123_p7)
}
  0x13   :  { %s127_s25 = scalar_lea.vmem %s30_s18, 256  ;;  %p132_p9 = scmp.lt.s32.totalorder %s30_s18, %s30_s18 }
  0x14   :  { %p128_p8 = scmp.ne.s32.totalorder %s30_s18, %s127_s25  ;;  %p133_p10 = scmp.lt.s32.totalorder %s127_s25, %s127_s25 }
  0x16   :  { %p134_p11 = por %p133_p10, %p132_p9 }
  0x18   :  { %p135_p12 = pnand %p134_p11, %p128_p8 }
  0x1a   :  { %138 = shalt.err (!%p135_p12)
}
  0x1b   :  { %s169_s26 = smov 32   ;;  %s170_s27 = smov 2  }
  0x1c   :  { %35 = dma.hbm_to_vmem [thread:$0]  %s230_s2, 256, %s30_s18, [#allocation4], %s169_s26, %s169_s26, %s170_s27  }
  0x1d   :  { %161 = dma.done.wait [#allocation6], 16  }
  0x1e   :  { %162 = vsyncadd [#allocation6], 4294967280 }
  0x1f   :  { %163 = dma.done.wait [#allocation4], 256  }
  0x20   :  { %164 = vsyncadd [#allocation4], 4294967040 }
  0x21   :  { %42 = sfence }
  0x22   :  { %s51_s30 = sld [smem:[#allocation3]]  ;;  %s97_s4 = sld [smem:[#allocation3 + $0x1]]  ;;  %v43_v0 = vld [vmem:[#allocation7] sm:$0x3]  ;;  %v44_v1 = vld [vmem:[#allocation7 + $0x2] sm:$0x3]  ;;  %v56_v6 = vstv %s229_s1 }
  0x23   :  { %s98_s5 = sld [smem:[#allocation3 + $0x2]]  ;;  %s99_s6 = sld [smem:[#allocation3 + $0x3]]  ;;  %v47_v2 = vld [vmem:[#allocation7 + $0x8] sm:$0x3]  ;;  %v48_v3 = vld [vmem:[#allocation7 + $0xa] sm:$0x3] }
  0x24   :  { %v45_v4 = vld [vmem:[#allocation7 + $0x4] sm:$0x3]  ;;  %v49_v11 = vld [vmem:[#allocation7 + $0xc] sm:$0x3]  ;;  %v46_v12 = vld [vmem:[#allocation7 + $0x6] sm:$0x3] }
  0x25   :  { %v50_v18 = vld [vmem:[#allocation7 + $0xe] sm:$0x3]  ;;  %s171_s1 = smov [#allocation8]  }
  0x26   :  { %s84_s2 = sshll.u32 %s171_s1, 4  ;;  %s85_s2 = int_to_ptr.vmem [resolvable:$true] %s84_s2 }
  0x27   :  { %s139_s9 = scalar_lea.vmem %s85_s2, 64  ;;  %p144_p0 = scmp.lt.s32.totalorder %s85_s2, %s85_s2 }
  0x28   :  { %v52_v5 = vstv %s51_s30  ;;  %v60_v7 = vstv %s97_s4  ;;  %p140_p13 = scmp.ne.s32.totalorder %s85_s2, %s139_s9  ;;  %p145_p1 = scmp.lt.s32.totalorder %s139_s9, %s139_s9 }
  0x29   :  { %v53_v8 = vmul.f32 %v52_v5, %v43_v0  ;;  %v61_v9 = vmul.f32 %v60_v7, %v44_v1  ;;  %v66_v10 = vstv %s98_s5  ;;  %v72_v13 = vstv %s99_s6 }
  0x2a   :  { %v54_v14 = vmul.f32 %v52_v5, %v47_v2  ;;  %v62_v15 = vmul.f32 %v60_v7, %v48_v3  ;;  %v67_v17 = vmul.f32 %v66_v10, %v45_v4  ;;  %v68_v20 = vmul.f32 %v66_v10, %v49_v11  ;;  %p146_p2 = por %p145_p1, %p144_p0 }
  0x2b   :  { %v57_v16 = vadd.f32 %v56_v6, %v53_v8  ;;  %v73_v22 = vmul.f32 %v72_v13, %v46_v12  ;;  %v74_v24 = vmul.f32 %v72_v13, %v50_v18 }
  0x2c   :  { %v58_v19 = vadd.f32 %v56_v6, %v54_v14  ;;  %p147_p3 = pnand %p146_p2, %p140_p13 }
  0x2d   :  { %v63_v21 = vadd.f32 %v61_v9, %v57_v16 }
  0x2e   :  { %v64_v23 = vadd.f32 %v62_v15, %v58_v19 }
  0x2f   :  { %v69_v25 = vadd.f32 %v67_v17, %v63_v21 }
  0x30   :  { %v70_v26 = vadd.f32 %v68_v20, %v64_v23 }
  0x31   :  { %v75_v27 = vadd.f32 %v73_v22, %v69_v25 }
  0x32   :  { %v76_v28 = vadd.f32 %v74_v24, %v70_v26 }
  0x33   :  { %77 = vst [vmem:[#allocation8] sm:$0x3] %v75_v27 }
  0x34   :  { %78 = vst [vmem:[#allocation8 + $0x2] sm:$0x3] %v76_v28 }
  0x35   :  { %150 = shalt.err (!%p147_p3)
}
  0x36   :  { %s151_s12 = scalar_lea.hbm %s231_s3, 64 }
  0x37   :  { %p152_p4 = scmp.ne.s32.totalorder %s231_s3, %s151_s12  ;;  %p155_p5 = scmp.lt.u32.totalorder %s151_s12, %s231_s3 }
  0x39   :  { %p157_p6 = pnand %p155_p5, %p152_p4 }
  0x3b   :  { %160 = shalt.err (!%p157_p6)
}
  0x3c   :  { %90 = dma.vmem_to_hbm [thread:$0]  %s85_s2, 64, %s231_s3, [#allocation5], %s169_s26, %s169_s26, %s170_s27  }
  0x3d   :  { %165 = dma.done.wait [#allocation5], 64  }
  0x3e   :  { %166 = vsyncadd [#allocation5], 4294967232 }
  0x3f   :  { %94 = vsyncpa [#allocation4], 1 }
  0x40   :  { %95 = vsyncpa [#allocation5], 1 }
  0x41   :  { %96 = vsyncpa [#allocation6], 1 }

</bundles_post_ra>
